<compile_context>
chip_gen: v7x
topology: tpu7x:2x2x1
jax: 0.10.0
libtpu: 0.0.40
codegen_flags: <defaults>
</compile_context>

<pallas_src>
import functools

import jax
import jax.numpy as jnp
from jax.experimental import pallas as pl
from jax.experimental.pallas import tpu as pltpu


def _round_up(n, m):
    return ((n + m - 1) // m) * m


# ---------------------------------------------------------------------------
# Kernel: whole network for one batch tile.
# ---------------------------------------------------------------------------
def mitnet_kernel(x_ref, wphi_ref, bphi_ref, whid_ref, bhid_ref,
                  wout_ref, bout_ref, out_ref, *, prop_col):
    # Shared representation phi: Linear -> ReLU (Dropout identity at inference).
    x = x_ref[...]                                                 # bf16 [TB, D]
    h = jnp.dot(x, wphi_ref[...], preferred_element_type=jnp.float32)
    h = jnp.maximum(h + bphi_ref[...], 0.0)                        # f32 [TB, H0p]

    # First Linear of all three heads fused into one matmul (columns packed).
    z = jnp.dot(h.astype(jnp.bfloat16), whid_ref[...],
                preferred_element_type=jnp.float32)
    z = jnp.maximum(z + bhid_ref[...], 0.0)                        # f32 [TB, 3*H1p]

    # Three small output projections fused into one block-structured matmul
    # producing a single lane-dense padded output.
    y = jnp.dot(z.astype(jnp.bfloat16), wout_ref[...],
                preferred_element_type=jnp.float32) + bout_ref[...]

    # Sigmoid only on the propensity lane (GradientReversal is identity in forward).
    lane = jax.lax.broadcasted_iota(jnp.int32, y.shape, 1)
    out_ref[...] = jnp.where(lane == prop_col, jax.nn.sigmoid(y), y)


# ---------------------------------------------------------------------------
# Wrapper: batch grid, resident packed weights, lane-dense output.
# ---------------------------------------------------------------------------
def mitnet_forward(x, packed, *, tile_b=128):
    B, D = x.shape
    out_dim = packed["out_dim"]
    prop_col = 2 * out_dim
    out_pad = packed["b_out"].shape[-1]

    b_pad = _round_up(B, tile_b)
    if b_pad != B:
        x = jnp.pad(x, ((0, b_pad - B), (0, 0)))
    x = x.astype(jnp.bfloat16)

    def resident(arr):
        return pl.BlockSpec(arr.shape, lambda i: (0, 0))

    # NOTE: activation slabs per tile are ~tile_b * 640 * 4B, so even tile_b=4096
    # stays far under v7x's 64 MiB VMEM; no vmem_limit_bytes override needed here.
    y = pl.pallas_call(
        functools.partial(mitnet_kernel, prop_col=prop_col),
        out_shape=jax.ShapeDtypeStruct((b_pad, out_pad), jnp.float32),
        grid=(b_pad // tile_b,),
        in_specs=[
            pl.BlockSpec((tile_b, D), lambda i: (i, 0)),
            resident(packed["w_phi"]), resident(packed["b_phi"]),
            resident(packed["w_hid"]), resident(packed["b_hid"]),
            resident(packed["w_out"]), resident(packed["b_out"]),
        ],
        out_specs=pl.BlockSpec((tile_b, out_pad), lambda i: (i, 0)),
        compiler_params=pltpu.CompilerParams(
            dimension_semantics=("parallel",)),
    )(x, packed["w_phi"], packed["b_phi"], packed["w_hid"],
      packed["b_hid"], packed["w_out"], packed["b_out"])

    out0 = y[:B, 0:out_dim]
    out1 = y[:B, out_dim:2 * out_dim]
    prop = y[:B, prop_col:prop_col + 1]
    return out0, out1, prop


# ---------------------------------------------------------------------------
# Parameter init (PyTorch Linear default init; weights stored [in, out]).
# ---------------------------------------------------------------------------
def init_params(input_dim, net_layers, key):
    H0, H1, out_dim = net_layers

    def lin(k, fi, fo):
        kw, kb = jax.random.split(k)
        s = 1.0 / jnp.sqrt(jnp.float32(fi))
        w = jax.random.uniform(kw, (fi, fo), jnp.float32, -s, s)
        b = jax.random.uniform(kb, (fo,), jnp.float32, -s, s)
        return w, b

    ks = jax.random.split(key, 7)
    p = {"net_layers": net_layers}
    p["w_phi"], p["b_phi"] = lin(ks[0], input_dim, H0)
    p["w0_1"], p["b0_1"] = lin(ks[1], H0, H1)
    p["w0_2"], p["b0_2"] = lin(ks[2], H1, out_dim)
    p["w1_1"], p["b1_1"] = lin(ks[3], H0, H1)
    p["w1_2"], p["b1_2"] = lin(ks[4], H1, out_dim)
    p["wp_1"], p["bp_1"] = lin(ks[5], H0, H1)
    p["wp_2"], p["bp_2"] = lin(ks[6], H1, 1)
    return p


def pack_params(p):
    """Pack + zero-pad weights into lane-aligned bf16 slabs (biases stay fp32)."""
    H0, H1, out_dim = p["net_layers"]
    D = p["w_phi"].shape[0]
    H0p = _round_up(H0, 128)
    H1p = _round_up(H1, 128)
    OUT_PAD = 128
    prop_col = 2 * out_dim
    assert prop_col + 1 <= OUT_PAD

    w_phi = jnp.zeros((D, H0p), jnp.float32).at[:, :H0].set(p["w_phi"])
    b_phi = jnp.zeros((1, H0p), jnp.float32).at[0, :H0].set(p["b_phi"])

    w_hid = jnp.zeros((H0p, 3 * H1p), jnp.float32)
    w_hid = w_hid.at[:H0, 0 * H1p:0 * H1p + H1].set(p["w0_1"])
    w_hid = w_hid.at[:H0, 1 * H1p:1 * H1p + H1].set(p["w1_1"])
    w_hid = w_hid.at[:H0, 2 * H1p:2 * H1p + H1].set(p["wp_1"])
    b_hid = jnp.zeros((1, 3 * H1p), jnp.float32)
    b_hid = b_hid.at[0, 0 * H1p:0 * H1p + H1].set(p["b0_1"])
    b_hid = b_hid.at[0, 1 * H1p:1 * H1p + H1].set(p["b1_1"])
    b_hid = b_hid.at[0, 2 * H1p:2 * H1p + H1].set(p["bp_1"])

    w_out = jnp.zeros((3 * H1p, OUT_PAD), jnp.float32)
    w_out = w_out.at[0 * H1p:0 * H1p + H1, 0:out_dim].set(p["w0_2"])
    w_out = w_out.at[1 * H1p:1 * H1p + H1, out_dim:2 * out_dim].set(p["w1_2"])
    w_out = w_out.at[2 * H1p:2 * H1p + H1, prop_col:prop_col + 1].set(p["wp_2"])
    b_out = jnp.zeros((1, OUT_PAD), jnp.float32)
    b_out = b_out.at[0, 0:out_dim].set(p["b0_2"])
    b_out = b_out.at[0, out_dim:2 * out_dim].set(p["b1_2"])
    b_out = b_out.at[0, prop_col:prop_col + 1].set(p["bp_2"])

    return {
        "w_phi": w_phi.astype(jnp.bfloat16), "b_phi": b_phi,
        "w_hid": w_hid.astype(jnp.bfloat16), "b_hid": b_hid,
        "w_out": w_out.astype(jnp.bfloat16), "b_out": b_out,
        "out_dim": out_dim,
    }


# ---------------------------------------------------------------------------
# References.
# ---------------------------------------------------------------------------
def mitnet_reference(x, p):
    """Pure fp32 reference mirroring the PyTorch module (eval mode)."""
    relu = lambda v: jnp.maximum(v, 0.0)
    h = relu(x @ p["w_phi"] + p["b_phi"])
    z0 = relu(h @ p["w0_1"] + p["b0_1"])
    out0 = z0 @ p["w0_2"] + p["b0_2"]
    z1 = relu(h @ p["w1_1"] + p["b1_1"])
    out1 = z1 @ p["w1_2"] + p["b1_2"]
    zp = relu(h @ p["wp_1"] + p["bp_1"])
    prop = jax.nn.sigmoid(zp @ p["wp_2"] + p["bp_2"])
    return out0, out1, prop


def packed_reference(x, packed):
    """Pure-JAX reference mirroring the kernel's bf16-input / f32-accum pipeline."""
    out_dim = packed["out_dim"]
    prop_col = 2 * out_dim
    xb = x.astype(jnp.bfloat16)
    h = jnp.maximum(jnp.dot(xb, packed["w_phi"],
                            preferred_element_type=jnp.float32) + packed["b_phi"], 0.0)
    z = jnp.maximum(jnp.dot(h.astype(jnp.bfloat16), packed["w_hid"],
                            preferred_element_type=jnp.float32) + packed["b_hid"], 0.0)
    y = jnp.dot(z.astype(jnp.bfloat16), packed["w_out"],
                preferred_element_type=jnp.float32) + packed["b_out"]
    out0 = y[:, 0:out_dim]
    out1 = y[:, out_dim:2 * out_dim]
    prop = jax.nn.sigmoid(y[:, prop_col:prop_col + 1])
    return out0, out1, prop


if __name__ == "__main__":
    # binary=False path: activations = [ReLU, ReLU, None] -> out0/out1 are raw linear outputs.
    # TODO(synk): binary=True would append activations[2]() (e.g. Sigmoid) to linears0/1 and
    # the loss() method is training-only; neither is implemented here. Dropout is identity (eval).
    B, D = 40, 16                  # batch padded to 48 -> 3 grid steps of tile_b=16
    net_layers = [50, 50, 1]       # [phi width, head hidden width, outcome dim]
    key = jax.random.PRNGKey(0)
    kx, kp = jax.random.split(key)
    x = jax.random.normal(kx, (B, D), jnp.float32)
    params = init_params(D, net_layers, kp)
    packed = pack_params(params)

    out0, out1, prop = mitnet_forward(x, packed, tile_b=16)
    jax.block_until_ready((out0, out1, prop))

    # Tight check vs a reference that mirrors the kernel's dtype pipeline exactly.
    p0, p1, pp = packed_reference(x, packed)
    assert jnp.allclose(out0, p0, atol=1e-3, rtol=1e-3)
    assert jnp.allclose(out1, p1, atol=1e-3, rtol=1e-3)
    assert jnp.allclose(prop, pp, atol=1e-3, rtol=1e-3)

    # Loose check vs the fp32 PyTorch-semantics reference (bf16 MXU tolerance).
    r0, r1, rp = mitnet_reference(x, params)
    assert jnp.allclose(out0, r0, atol=3e-2, rtol=3e-2)
    assert jnp.allclose(out1, r1, atol=3e-2, rtol=3e-2)
    assert jnp.allclose(prop, rp, atol=3e-2, rtol=3e-2)

    print("KERNEL_OK")
</pallas_src>

<mosaic_0001>
module attributes {stable_mosaic.version = 11 : i64} {
  func.func @mitnet_kernel(%arg0: i32, %arg1: memref<16x16xbf16, #tpu.memory_space<vmem>>, %arg2: memref<16x128xbf16, #tpu.memory_space<vmem>>, %arg3: memref<1x128xf32, #tpu.memory_space<vmem>>, %arg4: memref<128x384xbf16, #tpu.memory_space<vmem>>, %arg5: memref<1x384xf32, #tpu.memory_space<vmem>>, %arg6: memref<384x128xbf16, #tpu.memory_space<vmem>>, %arg7: memref<1x128xf32, #tpu.memory_space<vmem>>, %arg8: memref<16x128xf32, #tpu.memory_space<vmem>>) attributes {dimension_semantics = [#tpu.dimension_semantics<parallel>], iteration_bounds = array<i64: 3>, scalar_prefetch = 0 : i64, scratch_operands = 0 : i64, tpu.core_type = #tpu.core_type<tc>, window_params = [{transform_indices = @transform_0, window_bounds = array<i64: 16, 16>}, {pipeline_mode = #tpu.pipeline_mode<synchronous>, transform_indices = @transform_1, window_bounds = array<i64: 16, 128>}, {pipeline_mode = #tpu.pipeline_mode<synchronous>, transform_indices = @transform_2, window_bounds = array<i64: 1, 128>}, {pipeline_mode = #tpu.pipeline_mode<synchronous>, transform_indices = @transform_3, window_bounds = array<i64: 128, 384>}, {pipeline_mode = #tpu.pipeline_mode<synchronous>, transform_indices = @transform_4, window_bounds = array<i64: 1, 384>}, {pipeline_mode = #tpu.pipeline_mode<synchronous>, transform_indices = @transform_5, window_bounds = array<i64: 384, 128>}, {pipeline_mode = #tpu.pipeline_mode<synchronous>, transform_indices = @transform_6, window_bounds = array<i64: 1, 128>}, {transform_indices = @transform_7, window_bounds = array<i64: 16, 128>}]} {
    %c0 = arith.constant 0 : index
    %c0_0 = arith.constant 0 : index
    %0 = vector.load %arg1[%c0, %c0_0] : memref<16x16xbf16, #tpu.memory_space<vmem>>, vector<16x16xbf16>
    %c0_1 = arith.constant 0 : index
    %c0_2 = arith.constant 0 : index
    %1 = vector.load %arg2[%c0_1, %c0_2] : memref<16x128xbf16, #tpu.memory_space<vmem>>, vector<16x128xbf16>
    %cst = arith.constant dense<0.000000e+00> : vector<16x128xf32>
    %2 = tpu.matmul %0, %1, %cst {dimension_numbers = #tpu.dot_dimension_numbers<[1], [0], [0], [1], [0, 0, 1, 1], [], []>} : vector<16x16xbf16>, vector<16x128xbf16>, vector<16x128xf32> -> vector<16x128xf32>
    %c0_3 = arith.constant 0 : index
    %c0_4 = arith.constant 0 : index
    %3 = vector.load %arg3[%c0_3, %c0_4] : memref<1x128xf32, #tpu.memory_space<vmem>>, vector<1x128xf32>
    %4 = vector.broadcast %3 : vector<1x128xf32> to vector<16x128xf32>
    %5 = arith.addf %2, %4 : vector<16x128xf32>
    %cst_5 = arith.constant 0.000000e+00 : f32
    %6 = vector.broadcast %cst_5 : f32 to vector<16x128xf32>
    %7 = arith.maximumf %5, %6 : vector<16x128xf32>
    %8 = arith.truncf %7 : vector<16x128xf32> to vector<16x128xbf16>
    %c0_6 = arith.constant 0 : index
    %c0_7 = arith.constant 0 : index
    %9 = vector.load %arg4[%c0_6, %c0_7] : memref<128x384xbf16, #tpu.memory_space<vmem>>, vector<128x384xbf16>
    %cst_8 = arith.constant dense<0.000000e+00> : vector<16x384xf32>
    %10 = tpu.matmul %8, %9, %cst_8 {dimension_numbers = #tpu.dot_dimension_numbers<[1], [0], [0], [1], [0, 0, 1, 1], [], []>} : vector<16x128xbf16>, vector<128x384xbf16>, vector<16x384xf32> -> vector<16x384xf32>
    %c0_9 = arith.constant 0 : index
    %c0_10 = arith.constant 0 : index
    %11 = vector.load %arg5[%c0_9, %c0_10] : memref<1x384xf32, #tpu.memory_space<vmem>>, vector<1x384xf32>
    %12 = vector.broadcast %11 : vector<1x384xf32> to vector<16x384xf32>
    %13 = arith.addf %10, %12 : vector<16x384xf32>
    %cst_11 = arith.constant 0.000000e+00 : f32
    %14 = vector.broadcast %cst_11 : f32 to vector<16x384xf32>
    %15 = arith.maximumf %13, %14 : vector<16x384xf32>
    %16 = arith.truncf %15 : vector<16x384xf32> to vector<16x384xbf16>
    %c0_12 = arith.constant 0 : index
    %c0_13 = arith.constant 0 : index
    %17 = vector.load %arg6[%c0_12, %c0_13] : memref<384x128xbf16, #tpu.memory_space<vmem>>, vector<384x128xbf16>
    %cst_14 = arith.constant dense<0.000000e+00> : vector<16x128xf32>
    %18 = tpu.matmul %16, %17, %cst_14 {dimension_numbers = #tpu.dot_dimension_numbers<[1], [0], [0], [1], [0, 0, 1, 1], [], []>} : vector<16x384xbf16>, vector<384x128xbf16>, vector<16x128xf32> -> vector<16x128xf32>
    %c0_15 = arith.constant 0 : index
    %c0_16 = arith.constant 0 : index
    %19 = vector.load %arg7[%c0_15, %c0_16] : memref<1x128xf32, #tpu.memory_space<vmem>>, vector<1x128xf32>
    %20 = vector.broadcast %19 : vector<1x128xf32> to vector<16x128xf32>
    %21 = arith.addf %18, %20 : vector<16x128xf32>
    %22 = tpu.iota {dimensions = array<i32: 1>} : vector<16x128xi32>
    %c2_i32 = arith.constant 2 : i32
    %23 = vector.broadcast %c2_i32 : i32 to vector<16x128xi32>
    %24 = arith.cmpi eq, %22, %23 : vector<16x128xi32>
    %25 = arith.negf %21 : vector<16x128xf32>
    %26 = math.exp %25 : vector<16x128xf32>
    %cst_17 = arith.constant 1.000000e+00 : f32
    %27 = vector.broadcast %cst_17 : f32 to vector<16x128xf32>
    %28 = arith.addf %27, %26 : vector<16x128xf32>
    %29 = arith.divf %27, %28 : vector<16x128xf32>
    %30 = arith.select %24, %29, %21 : vector<16x128xi1>, vector<16x128xf32>
    %c0_18 = arith.constant 0 : index
    %c0_19 = arith.constant 0 : index
    %31 = vector.load %arg8[%c0_18, %c0_19] : memref<16x128xf32, #tpu.memory_space<vmem>>, vector<16x128xf32>
    tpu.vector_store %arg8[%c0_18, %c0_19], %30 {strides = array<i32>} : memref<16x128xf32, #tpu.memory_space<vmem>>, vector<16x128xf32>,
    return
  }
  func.func @transform_0(%arg0: i32) -> (i32, i32) {
    %c0_i32 = arith.constant 0 : i32
    %c0_i32_0 = arith.constant 0 : i32
    return %arg0, %c0_i32 : i32, i32
  }
  func.func @transform_1(%arg0: i32) -> (i32, i32) {
    %c0_i32 = arith.constant 0 : i32
    %c0_i32_0 = arith.constant 0 : i32
    %c0_i32_1 = arith.constant 0 : i32
    return %c0_i32, %c0_i32_0 : i32, i32
  }
  func.func @transform_2(%arg0: i32) -> (i32, i32) {
    %c0_i32 = arith.constant 0 : i32
    %c0_i32_0 = arith.constant 0 : i32
    %c0_i32_1 = arith.constant 0 : i32
    return %c0_i32, %c0_i32_0 : i32, i32
  }
  func.func @transform_3(%arg0: i32) -> (i32, i32) {
    %c0_i32 = arith.constant 0 : i32
    %c0_i32_0 = arith.constant 0 : i32
    %c0_i32_1 = arith.constant 0 : i32
    return %c0_i32, %c0_i32_0 : i32, i32
  }
  func.func @transform_4(%arg0: i32) -> (i32, i32) {
    %c0_i32 = arith.constant 0 : i32
    %c0_i32_0 = arith.constant 0 : i32
    %c0_i32_1 = arith.constant 0 : i32
    return %c0_i32, %c0_i32_0 : i32, i32
  }
  func.func @transform_5(%arg0: i32) -> (i32, i32) {
    %c0_i32 = arith.constant 0 : i32
    %c0_i32_0 = arith.constant 0 : i32
    %c0_i32_1 = arith.constant 0 : i32
    return %c0_i32, %c0_i32_0 : i32, i32
  }
  func.func @transform_6(%arg0: i32) -> (i32, i32) {
    %c0_i32 = arith.constant 0 : i32
    %c0_i32_0 = arith.constant 0 : i32
    %c0_i32_1 = arith.constant 0 : i32
    return %c0_i32, %c0_i32_0 : i32, i32
  }
  func.func @transform_7(%arg0: i32) -> (i32, i32) {
    %c0_i32 = arith.constant 0 : i32
    %c0_i32_0 = arith.constant 0 : i32
    return %arg0, %c0_i32 : i32, i32
  }
}

</mosaic_0001>

<bundles_post_ra>
// kernel: tpu_custom_call.1
= control target key start
LH: loop header
LB: loop body
LE: loop exit
PB: predicated region body
PF: predicated region fallthrough
CT: control target
= control target key end

     0   :  { %12 = vsyncpa [#allocation3], 0  ;;  %s1733_s0 = inlined_call_operand.vmem [shape: bf16[48,16], index: 0, kind: input, shape index: {}]   ;;  %s1734_s1 = inlined_call_operand.vmem [shape: bf16[16,128], index: 1, kind: input, shape index: {}]   ;;  %s1735_s2 = inlined_call_operand.vmem [shape: f32[1,128], index: 2, kind: input, shape index: {}]   ;;  %s1736_s3 = inlined_call_operand.hbm [shape: bf16[128,384], index: 3, kind: input, shape index: {}]   ;;  %s1737_s4 = inlined_call_operand.vmem [shape: f32[1,384], index: 4, kind: input, shape index: {}]   ;;  %s1738_s5 = inlined_call_operand.hbm [shape: bf16[384,128], index: 5, kind: input, shape index: {}]   ;;  %s1739_s6 = inlined_call_operand.vmem [shape: f32[1,128], index: 6, kind: input, shape index: {}]   ;;  %s1740_s7 = inlined_call_operand.hbm [shape: f32[48,128], index: 7, kind: output, shape index: {}]  }
   0x1   :  { %13 = vsyncpa [#allocation6], 0 }
   0x2   :  { %14 = vsyncpa [#allocation4], 0 }
   0x3   :  { %16 = vsyncpa [#allocation4 + $0x1], 0  ;;  %s1524_s24 = smov 0   ;;  %s1526_s25 = smov 0  }
   0x4   :  { %s1528_s26 = smov 0   ;;  %s1530_s27 = smov 0  }
   0x5 LB: > { %s1545_s28 = sadd.s32 4294967295, %s1470_s27   ;;  %s1049_s29 = sadd.s32 4294967294, %s1470_s27   ;;  %s1470_s27 = sphi %s1530_s27, %s1760_s27   ;;  %s1466_s26 = sphi %s1528_s26, %s1759_s26   ;;  %s1462_s25 = sphi %s1526_s25, %s1758_s25   ;;  %s1458_s24 = sphi %s1524_s24, %s1757_s24  }
   0x6   : > { %s1549_s30 = sadd.s32 1, %s1470_s27   ;;  %s181_s8 = sadd.s32 1, %s1466_s26 }
   0x7   : > { %s178_s9 = ssub.s32 %s1470_s27, %s1549_s30  ;;  %p191_p0 = scmp.ne.s32.totalorder %s1466_s26, %s1462_s25 }
   0x8   : > { %p179_p1 = scmp.eq.s32.totalorder %s178_s9, 0  ;;  %p192_p2 = scmp.eq.s32.totalorder %s1545_s28, 2 }
   0x9   : > { %p197_p3 = scmp.ne.s32.totalorder %s1462_s25, %s1458_s24  ;;  %p198_p4 = scmp.eq.s32.totalorder %s1049_s29, 2 }
   0xa   : > { %s1560_s10 = scalar_select %p179_p1, %s1466_s26, %s181_s8  }
   0xb   : > { %p1562_p5 = por %p192_p2, %p191_p0  ;;  %p1566_p6 = por %p198_p4, %p197_p3 }
   0xc   : > { %1744 = sst [smem:[#allocation11_spill]] %s1560_s10  ;;  %p1050_p7 = scmp.ge.s32.totalorder %s1470_s27, 1 }
   0xd   : > { %s1745_s11 = scalar_select %p1562_p5, 1, 0 }
   0xe   : > { %s1746_s12 = scalar_select %p1566_p6, 1, 0 }
   0xf   : > { %p205_p8 = scmp.lt.s32.totalorder %s1470_s27, 4  ;;  %p1741_p9 = scmp.eq.s32.totalorder %s1545_s28, 0 }
  0x10   : > { %s1472_s14 = smov [#allocation2]   ;;  %s1473_s17 = smov [#allocation5]  }
  0x11   : > { %p1573_p10 = pnand %p1050_p7, %p205_p8  ;;  %s223_s15 = sshll.u32 %s1472_s14, 4  ;;  %s224_s15 = int_to_ptr.vmem [resolvable:$true] %s223_s15 }
  0x12   : > { %s239_s18 = sshll.u32 %s1473_s17, 4  ;;  %s1344_s21 = scalar_lea.hbm %s1736_s3, 3072  ;;  %s1585_s18 = int_to_ptr.vmem [resolvable:$true] %s239_s18 }
  0x13   : > { %s1747_s13 = scalar_select %p1573_p10, 1, 0 }
  0x14   : > { %p1219_p11 = pneg %p1573_p10  ;;  %p1345_p13 = scmp.ne.s32.totalorder %s1736_s3, %s1344_s21 }
  0x15   : > { %p1351_p3 = scmp.lt.u32.totalorder %s1344_s21, %s1736_s3 }
  0x16   : > { %p1581_p12 = pnand %p1741_p9, %p1219_p11 }
  0x18   : > { %p1346_p0 = pneg %p1581_p12 }
  0x1a   : > { %p1347_p1 = pnand %p1346_p0, %p1345_p13 }
  0x1c   : > { %p1348_p2 = pneg %p1347_p1 }
  0x1e   : > { %p1353_p4 = pnand %p1351_p3, %p1348_p2 }
  0x20   : > { %1356 = shalt.err (!%p1353_p4)
}
  0x21   : > { %s1357_s9 = scalar_lea.vmem %s224_s15, 3072  ;;  %p1365_p9 = scmp.lt.s32.totalorder %s224_s15, %s224_s15 }
  0x22   : > { %p1358_p7 = scmp.ne.s32.totalorder %s224_s15, %s1357_s9  ;;  %p1366_p6 = scmp.lt.s32.totalorder %s1357_s9, %s1357_s9 }
  0x24   : > { %p1360_p8 = pnand %p1358_p7, %p1346_p0  ;;  %p1367_p5 = por %p1366_p6, %p1365_p9 }
  0x26   : > { %p1361_p11 = pneg %p1360_p8 }
  0x28   : > { %p1368_p10 = pnand %p1367_p5, %p1361_p11 }
  0x2a   : > { %1371 = shalt.err (!%p1368_p10)
}
  0x2b   : > { %s1474_s14 = smov 192   ;;  %s1475_s17 = smov 12  }
  0x2c   : > { %1222 = dma.hbm_to_vmem [thread:$0]  (!%p1581_p12), %s1736_s3, 3072, %s224_s15, [#allocation3], %s1474_s14, %s1474_s14, %s1475_s17  }
  0x2d   : > { %s1372_s23 = scalar_lea.hbm %s1738_s5, 3072 }
  0x2e   : > { %p1373_p13 = scmp.ne.s32.totalorder %s1738_s5, %s1372_s23  ;;  %p1379_p9 = scmp.lt.u32.totalorder %s1372_s23, %s1738_s5 }
  0x30   : > { %p1375_p5 = pnand %p1373_p13, %p1346_p0 }
  0x32   : > { %p1376_p6 = pneg %p1375_p5 }
  0x34   : > { %p1381_p10 = pnand %p1379_p9, %p1376_p6 }
  0x36   : > { %1384 = shalt.err (!%p1381_p10)
}
  0x37   : > { %s1385_s15 = scalar_lea.vmem %s1585_s18, 3072  ;;  %p1393_p4 = scmp.lt.s32.totalorder %s1585_s18, %s1585_s18 }
  0x38   : > { %p1386_p1 = scmp.ne.s32.totalorder %s1585_s18, %s1385_s15  ;;  %p1394_p7 = scmp.lt.s32.totalorder %s1385_s15, %s1385_s15 }
  0x3a   : > { %p1388_p2 = pnand %p1386_p1, %p1346_p0  ;;  %p1395_p8 = por %p1394_p7, %p1393_p4 }
  0x3c   : > { %p1389_p3 = pneg %p1388_p2 }
  0x3e   : > { %p1396_p11 = pnand %p1395_p8, %p1389_p3 }
  0x40   : > { %1399 = shalt.err (!%p1396_p11)
}
  0x41   : > { %s1476_s10 = smov 64   ;;  %s1477_s14 = smov 4  }
  0x42   : > { %1225 = dma.hbm_to_vmem [thread:$0]  (!%p1581_p12), %s1738_s5, 3072, %s1585_s18, [#allocation6], %s1476_s10, %s1476_s10, %s1477_s14  }
  0x43   : > { %p1749_p13 = scmp.ne.s32.totalorder %s1747_s13, 0 }
  0x44   : > { %p1750_p0 = scmp.eq.s32.totalorder (!%p1749_p13), %s1545_s28, 0 }
  0x45   : > { %267 = sbr.rel (%p1749_p13) target bundleno = 792 (0x318), region = 48 }
  0x4c   : > { %1445 = dma.done.wait (%p1750_p0), [#allocation3], 3072   ;;  %p1751_p5 = pmov %p1750_p0 }
  0x4d   : > { %p1752_p6 = pmov %p1750_p0 }
  0x4e   : > { %1447 = vsyncadd (%p1751_p5), [#allocation3], 4294964224 }
  0x4f   : > { %1449 = dma.done.wait (%p1752_p6), [#allocation6], 3072   ;;  %p1753_p9 = pmov %p1750_p0 }
  0x50   : > { %s1058_s16 = sshll.u32 %s1545_s28, 1  ;;  %v1478_v0 = vmov 0.0   ;;  %vm1479_vm0 = vmmov 0   ;;  %v1278_v1 = vld [vmem:[%s1734_s1] sm:$0xff]   ;;  %vm333_vm1 = vcmask 130048   ;;  %v1480_v27 = vmov 0  }
  0x51   : > { %1451 = vsyncadd (%p1753_p9), [#allocation6], 4294964224  ;;  %1163 = vmatprep.subr.bf16.mxu0 %v1478_v0  ;;  %1165 = vmatprep.mubr.msk.bf16.mxu0 %vm1479_vm0, %v1478_v0  ;;  %p304_p12 = scmp.lt.s32.totalorder %s1058_s16, 5  ;;  %v1280_v3 = vld [vmem:[#allocation2 + $0x4] ss:$12 sps:$4 sm:$0xff]   ;;  %v1316_v41 = vld [vmem:[#allocation5 + $0x48] sm:$0xff]   ;;  %v415_v62 = vlaneseq }
  0x52   : > { %1164 = vmatpush3.bf16.msra.mxu0 %v1278_v1  ;;  %v1282_v4 = vld [vmem:[#allocation2] ss:$12 sps:$4 sm:$0xff]   ;;  %558 = vmatprep.subr.bf16.mxu1 %v1280_v3  ;;  %v1283_v5 = vld [vmem:[#allocation2 + $0x8] ss:$12 sps:$4 sm:$0xff]   ;;  %v1286_v7 = vld [vmem:[#allocation2 + $0x18] ss:$12 sps:$4 sm:$0xff]  }
  0x53   : > { %s1762_s16 = smov (!%p304_p12, %s1058_s16), 5  ;;  %1169 = vmatprep.subr.bf16.mxu0 %v1478_v0  ;;  %559 = vmatpush1.bf16.msra.mxu1 %v1282_v4  ;;  %v1284_v6 = vld [vmem:[#allocation2 + $0x1c] ss:$12 sps:$4 sm:$0xff]   ;;  %v1287_v8 = vld [vmem:[#allocation2 + $0x20] ss:$12 sps:$4 sm:$0xff]   ;;  %v1319_v44 = vld [vmem:[#allocation5 + $0x50] sm:$0xff]  }
  0x54   : > { %s1059_s13 = sshll.u32 %s1762_s16, 2  ;;  %560 = vmatprep.subr.bf16.mxu1 %v1284_v6  ;;  %v1288_v9 = vld [vmem:[#allocation2 + $0x34] ss:$12 sps:$4 sm:$0xff]   ;;  %v1290_v10 = vld [vmem:[#allocation2 + $0x30] ss:$12 sps:$4 sm:$0xff]   ;;  %590 = vmatprep.mubr.bf16.mxu1 %v1480_v27  ;;  %v1315_v42 = vld [vmem:[#allocation5 + $0x88] sm:$0xff]  }
  0x55   : > { %s307_s21 = scalar_lea.vmem %s1733_s0, %s1059_s13  ;;  %v1291_v11 = vld [vmem:[#allocation2 + $0x38] ss:$12 sps:$4 sm:$0xff]   ;;  %v1294_v13 = vld [vmem:[#allocation2 + $0x48] ss:$12 sps:$4 sm:$0xff]   ;;  %v1295_v14 = vld [vmem:[#allocation2 + $0x50] ss:$12 sps:$4 sm:$0xff]  }
  0x56   : > { %v1279_v2 = vld [vmem:[%s307_s21] sm:$0xff]   ;;  %v1292_v12 = vld [vmem:[#allocation2 + $0x4c] ss:$12 sps:$4 sm:$0xff]   ;;  %v1299_v17 = vld [vmem:[#allocation2 + $0x68] ss:$12 sps:$4 sm:$0xff]   ;;  %v416_v63 = vshrl.u32 %v415_v62, 7 }
  0x57   : > { %1166 = vmatmul.mubr.msk.bf16.vlgmr.msra.gmra.mrb[0].mxu0 %vm333_vm1, %v1279_v2  ;;  %561 = vmatpush1.bf16.msra.mxu1 %v1286_v7  ;;  %v1296_v15 = vld [vmem:[#allocation2 + $0x64] ss:$12 sps:$4 sm:$0xff]   ;;  %v1298_v16 = vld [vmem:[#allocation2 + $0x60] ss:$12 sps:$4 sm:$0xff]   ;;  %v1300_v18 = vld [vmem:[#allocation2 + $0x7c] ss:$12 sps:$4 sm:$0xff]  }
  0x58   : > { %1170 = vmatpush3.bf16.msra.mxu0 %v1283_v5  ;;  %1185 = vmatprep.mubr.msk.bf16.mxu0 %vm1479_vm0, %v1478_v0  ;;  %v1302_v19 = vld [vmem:[#allocation2 + $0x78] ss:$12 sps:$4 sm:$0xff]   ;;  %v1303_v20 = vld [vmem:[#allocation2 + $0x80] ss:$12 sps:$4 sm:$0xff]   ;;  %v1306_v22 = vld [vmem:[#allocation2 + $0x90] ss:$12 sps:$4 sm:$0xff]  }
  0x59   : > { %1171 = vmatprep.subr.bf16.mxu0 %v1478_v0  ;;  %562 = vmatprep.subr.bf16.mxu1 %v1288_v9  ;;  %v1304_v21 = vld [vmem:[#allocation2 + $0x94] ss:$12 sps:$4 sm:$0xff]   ;;  %v1307_v23 = vld [vmem:[#allocation2 + $0x98] ss:$12 sps:$4 sm:$0xff]   ;;  %v1311_v26 = vld [vmem:[#allocation2 + $0xb0] ss:$12 sps:$4 sm:$0xff]  }
  0x5a   : > { %v1308_v24 = vld [vmem:[#allocation2 + $0xac] ss:$12 sps:$4 sm:$0xff]   ;;  %v1310_v25 = vld [vmem:[#allocation2 + $0xa8] ss:$12 sps:$4 sm:$0xff]   ;;  %v1313_v28 = vld [vmem:[#allocation5 + $0x40] sm:$0xff]   ;;  %v417_v1 = vsub.s32 0, %v416_v63 }
  0x5b   : > { %563 = vmatpush1.bf16.msra.mxu1 %v1290_v10  ;;  %v1060_v29 = vld [vmem:[%s1735_s2] ss:$0 sm:$0xff]  ;;  %v1317_v43 = vld [vmem:[#allocation5 + $0x8] sm:$0xff]   ;;  %v1318_v45 = vld [vmem:[#allocation5 + $0x90] sm:$0xff]   ;;  %v425_v2 = vsub.s32 2, %v416_v63  ;;  %v421_v4 = vsub.s32 1, %v416_v63 }
  0x5c   : > { %1172 = vmatpush3.bf16.msra.mxu0 %v1287_v8  ;;  %564 = vmatprep.subr.bf16.mxu1 %v1292_v12  ;;  %v1312_v38 = vld [vmem:[#allocation5 + $0x80] sm:$0xff]   ;;  %v1320_v46 = vld [vmem:[#allocation5 + $0x10] sm:$0xff]   ;;  %v1322_v47 = vld [vmem:[#allocation5 + $0x58] sm:$0xff]   ;;  %s300_s17 = sand.u32 1, %s1462_s25   ;;  %s1120_s16 = sshll.u32 %s1545_s28, 8 }
  0x5d   : > { %1173 = vmatprep.subr.bf16.mxu0 %v1478_v0  ;;  %v1314_v39 = vld [vmem:[#allocation5] sm:$0xff]   ;;  %v1321_v48 = vld [vmem:[#allocation5 + $0x98] sm:$0xff]   ;;  %v1328_v53 = vld [vmem:[#allocation5 + $0x68] sm:$0xff]   ;;  %s1057_s19 = sshll.u32 %s300_s17, 4  ;;  %s1688_s22 = scalar_lea.hbm %s1740_s7, %s1120_s16 }
  0x5e   : > { %v1323_v49 = vld [vmem:[#allocation5 + $0x18] sm:$0xff]   ;;  %v1325_v50 = vld [vmem:[#allocation5 + $0x60] sm:$0xff]   ;;  %v1327_v54 = vld [vmem:[#allocation5 + $0xa8] sm:$0xff]   ;;  %s302_s13 = scalar_lea.vmem [#allocation7], %s1057_s19  ;;  %s1692_s23 = scalar_lea.sflag [#allocation4], %s300_s17 }
  0x5f   : > { %565 = vmatpush1.bf16.msra.mxu1 %v1294_v13  ;;  %v1324_v51 = vld [vmem:[#allocation5 + $0xa0] sm:$0xff]   ;;  %v1329_v55 = vld [vmem:[#allocation5 + $0x28] sm:$0xff]   ;;  %v1330_v56 = vld [vmem:[#allocation5 + $0xb0] sm:$0xff]   ;;  %s965_s18 = sshll.u32 %s302_s13, 4  ;;  %p1754_p1 = scmp.ne.s32.totalorder %s1745_s11, 0  ;;  %s1690_s18 = int_to_ptr.vmem [resolvable:$true] %s965_s18 }
  0x60   : > { %1174 = vmatpush3.bf16.msra.mxu0 %v1291_v11  ;;  %566 = vmatprep.subr.bf16.mxu1 %v1296_v15  ;;  %v1326_v52 = vld [vmem:[#allocation5 + $0x20] sm:$0xff]   ;;  %v1331_v57 = vld [vmem:[#allocation5 + $0x70] sm:$0xff]   ;;  %v1333_v59 = vld [vmem:[#allocation5 + $0xb8] sm:$0xff]   ;;  %s1400_s28 = scalar_lea.vmem %s1690_s18, 256  ;;  %s1481_s29 = smov [#allocation7]  }
  0x61   : > { %1175 = vmatprep.subr.bf16.mxu0 %v1478_v0  ;;  %v1332_v58 = vld [vmem:[#allocation5 + $0x30] sm:$0xff]   ;;  %v1334_v60 = vld [vmem:[#allocation5 + $0x78] sm:$0xff]   ;;  %v413_v3 = vld [vmem:[%s1737_s4] sm:$0x7]  ;;  %p1401_p10 = scmp.ne.s32.totalorder %s1690_s18, %s1400_s28  ;;  %s1404_s8 = sshll.u32 %s1481_s29, 4  ;;  %s1405_s8 = int_to_ptr.vmem [resolvable:$false] %s1404_s8 }
  0x62   : > { %v1335_v61 = vld [vmem:[#allocation5 + $0x38] sm:$0xff]   ;;  %v418_v5 = vrot.slane %v413_v3, %v417_v1  ;;  %v426_v6 = vrot.slane %v413_v3, %v425_v2  ;;  %v422_v7 = vrot.slane %v413_v3, %v421_v4  ;;  %s1406_s9 = scalar_lea.vmem %s1405_s8, 512  ;;  %p1407_p4 = scmp.lt.s32.totalorder %s1690_s18, %s1405_s8 }
  0x63   : > { %567 = vmatpush1.bf16.msra.mxu1 %v1298_v16  ;;  %p1402_p2 = pnand %p1401_p10, %p1754_p1  ;;  %p1408_p7 = scmp.lt.s32.totalorder %s1406_s9, %s1400_s28 }
  0x64   : > { %1176 = vmatpush3.bf16.msra.mxu0 %v1295_v14  ;;  %568 = vmatprep.subr.bf16.mxu1 %v1300_v18 }
  0x65   : > { %1177 = vmatprep.subr.bf16.mxu0 %v1478_v0  ;;  %p1403_p3 = pneg %p1402_p2  ;;  %p1409_p8 = por %p1408_p7, %p1407_p4 }
  0x67   : > { %569 = vmatpush1.bf16.msra.mxu1 %v1302_v19  ;;  %p1410_p11 = pnand %p1409_p8, %p1403_p3 }
  0x68   : > { %1178 = vmatpush3.bf16.msra.mxu0 %v1299_v17  ;;  %570 = vmatprep.subr.bf16.mxu1 %v1304_v21 }
  0x69   : > { %1179 = vmatprep.subr.bf16.mxu0 %v1478_v0 }
  0x6b   : > { %571 = vmatpush1.bf16.msra.mxu1 %v1306_v22 }
  0x6c   : > { %1180 = vmatpush3.bf16.msra.mxu0 %v1303_v20  ;;  %572 = vmatprep.subr.bf16.mxu1 %v1308_v24 }
  0x6d   : > { %1181 = vmatprep.subr.bf16.mxu0 %v1478_v0 }
  0x6f   : > { %573 = vmatpush1.bf16.msra.mxu1 %v1310_v25 }
  0x70   : > { %1182 = vmatpush3.bf16.msra.mxu0 %v1307_v23  ;;  %1132 = vmatprep.subr.bf16.mxu1 %v1313_v28 }
  0x71   : > { %1183 = vmatprep.subr.bf16.mxu0 %v1478_v0 }
  0x74   : > { %1184 = vmatpush3.bf16.msra.mxu0 %v1311_v26 }
  0x75   : > { %1189 = vmatprep.subr.bf16.mxu0 %v1478_v0 }
 0x12a   : > { %v371_v30 = vpop.f32.mrb[0].mxu0 }
 0x12b   : > { %v372_v31 = vadd.f32 %v1060_v29, %v371_v30  ;;  %v1167_v32 = vpop.f32.mrb[1].mxu0 }
 0x12c   : > { %v374_v33 = vpop.f32.mrb[2].mxu0 }
 0x12d   : > { %v375_v34 = vadd.f32 %v1060_v29, %v374_v33  ;;  %v1168_v35 = vpop.f32.mrb[3].mxu0  ;;  %v378_v36 = vmax.f32 %v372_v31, 0.0 }
 0x12f   : > { %v379_v37 = vmax.f32 %v375_v34, 0.0  ;;  %v1088_v34 = vld [vmem:[%s1739_s6] ss:$0 sm:$0xff] }
 0x131   : > { %v380_v40 = vpack.c.bf16 %v379_v37, %v378_v36 }
 0x133   : > { %591 = vmatmul.mubr.bf16.vlgmr.msra.gmra.mrb[0].mxu1 %v380_v40  ;;  %1186 = vmatmul.mubr.bf16.vlgmr.msra.gmra.mrb[4].mxu0 %v380_v40 }
 0x134   : > { %1190 = vmatpush3.bf16.msra.mxu0 %v1312_v38  ;;  %1133 = vmatpush3.bf16.msra.mxu1 %v1314_v39 }
 0x135   : > { %1191 = vmatprep.subr.bf16.mxu0 %v1478_v0  ;;  %1134 = vmatprep.subr.bf16.mxu1 %v1316_v41 }
 0x136   : > { %1205 = vmatprep.mubr.msk.bf16.mxu0 %vm1479_vm0, %v1478_v0 }
 0x138   : > { %1192 = vmatpush3.bf16.msra.mxu0 %v1315_v42  ;;  %1135 = vmatpush3.bf16.msra.mxu1 %v1317_v43 }
 0x139   : > { %1193 = vmatprep.subr.bf16.mxu0 %v1478_v0  ;;  %1136 = vmatprep.subr.bf16.mxu1 %v1319_v44 }
 0x13c   : > { %1194 = vmatpush3.bf16.msra.mxu0 %v1318_v45  ;;  %1137 = vmatpush3.bf16.msra.mxu1 %v1320_v46 }
 0x13d   : > { %1195 = vmatprep.subr.bf16.mxu0 %v1478_v0  ;;  %1138 = vmatprep.subr.bf16.mxu1 %v1322_v47 }
 0x140   : > { %1196 = vmatpush3.bf16.msra.mxu0 %v1321_v48  ;;  %1139 = vmatpush3.bf16.msra.mxu1 %v1323_v49 }
 0x141   : > { %1197 = vmatprep.subr.bf16.mxu0 %v1478_v0  ;;  %1140 = vmatprep.subr.bf16.mxu1 %v1325_v50 }
 0x144   : > { %1198 = vmatpush3.bf16.msra.mxu0 %v1324_v51  ;;  %1141 = vmatpush3.bf16.msra.mxu1 %v1326_v52  ;;  %v933_v51 = vand.u32 127, %v415_v62 }
 0x145   : > { %1199 = vmatprep.subr.bf16.mxu0 %v1478_v0  ;;  %1142 = vmatprep.subr.bf16.mxu1 %v1328_v53 }
 0x146   : > { %vm934_vm2 = vcmp.eq.s32.totalorder %v933_v51, 2 }
 0x148   : > { %1200 = vmatpush3.bf16.msra.mxu0 %v1327_v54  ;;  %1143 = vmatpush3.bf16.msra.mxu1 %v1329_v55 }
 0x149   : > { %1201 = vmatprep.subr.bf16.mxu0 %v1478_v0  ;;  %1144 = vmatprep.subr.bf16.mxu1 %v1331_v57 }
 0x14c   : > { %1202 = vmatpush3.bf16.msra.mxu0 %v1330_v56  ;;  %1145 = vmatpush3.bf16.msra.mxu1 %v1332_v58 }
 0x14d   : > { %1203 = vmatprep.subr.bf16.mxu0 %v1478_v0  ;;  %1146 = vmatprep.subr.bf16.mxu1 %v1334_v60 }
 0x150   : > { %1204 = vmatpush3.bf16.msra.mxu0 %v1333_v59  ;;  %1147 = vmatpush3.bf16.msra.mxu1 %v1335_v61 }
 0x206   : > { %v592_v0 = vpop.f32.mrb[0].mxu1  ;;  %v635_v8 = vpop.f32.mrb[4].mxu0 }
 0x207   : > { %v593_v9 = vadd.f32 %v592_v0, %v418_v5  ;;  %v636_v10 = vadd.f32 %v635_v8, %v426_v6  ;;  %v594_v11 = vpop.f32.mrb[1].mxu1  ;;  %v1187_v12 = vpop.f32.mrb[5].mxu0 }
 0x208   : > { %v595_v13 = vadd.f32 %v594_v11, %v422_v7  ;;  %v596_v14 = vpop.f32.mrb[2].mxu1  ;;  %v638_v15 = vpop.f32.mrb[6].mxu0 }
 0x209   : > { %v597_v16 = vadd.f32 %v596_v14, %v418_v5  ;;  %v639_v17 = vadd.f32 %v638_v15, %v426_v6  ;;  %v598_v18 = vpop.f32.mrb[3].mxu1  ;;  %v1188_v19 = vpop.f32.mrb[7].mxu0  ;;  %v642_v21 = vmax.f32 %v593_v9, 0.0  ;;  %v644_v22 = vmax.f32 %v636_v10, 0.0 }
 0x20a   : > { %v599_v20 = vadd.f32 %v598_v18, %v422_v7  ;;  %v643_v25 = vmax.f32 %v595_v13, 0.0 }
 0x20b   : > { %v645_v23 = vmax.f32 %v597_v16, 0.0  ;;  %v647_v24 = vmax.f32 %v639_v17, 0.0 }
 0x20c   : > { %v646_v26 = vmax.f32 %v599_v20, 0.0 }
 0x20d   : > { %v648_v27 = vpack.c.bf16 %v645_v23, %v642_v21  ;;  %v650_v28 = vpack.c.bf16 %v647_v24, %v644_v22 }
 0x20e   : > { %v649_v29 = vpack.c.bf16 %v646_v26, %v643_v25 }
 0x20f   : > { %1206 = vmatmul.mubr.bf16.vlgmr.msra.gmra.mrb[8].mxu0 %v650_v28 }
 0x210   : > { %882 = vmatprep.mubr.bf16.mxu1 %v649_v29 }
 0x211   : > { %883 = vmatmul.mubr.bf16.vlgmr.msra.gmra.mrb[4].mxu1 %v648_v27 }
 0x2e2   : > { %v925_v30 = vpop.f32.mrb[8].mxu0 }
 0x2e3   : > { %v1207_v31 = vpop.f32.mrb[9].mxu0 }
 0x2e4   : > { %v1148_v32 = vpop.f32.mrb[4].mxu1  ;;  %v928_v33 = vpop.f32.mrb[10].mxu0 }
 0x2e5   : > { %v1149_v35 = vpop.f32.mrb[5].mxu1  ;;  %v1208_v36 = vpop.f32.mrb[11].mxu0 }
 0x2e6   : > { %v1150_v37 = vadd.f32 %v1149_v35, %v1148_v32  ;;  %v1151_v38 = vpop.f32.mrb[6].mxu1 }
 0x2e7   : > { %v1152_v39 = vpop.f32.mrb[7].mxu1 }
 0x2e8   : > { %v885_v40 = vadd.f32 %v1150_v37, %v1088_v34  ;;  %v1153_v41 = vadd.f32 %v1152_v39, %v1151_v38 }
 0x2ea   : > { %v926_v42 = vadd.f32 %v925_v30, %v885_v40  ;;  %v888_v43 = vadd.f32 %v1153_v41, %v1088_v34 }
 0x2ec   : > { %v1113_v44 = vmul.f32 -1.442695, %v926_v42  ;;  %v929_v45 = vadd.f32 %v928_v33, %v888_v43 }
 0x2ee   : > { %1336 = vpow2.f32 %v1113_v44  ;;  %v1114_v46 = vmul.f32 -1.442695, %v929_v45 }
 0x2f0   : > { %1338 = vpow2.f32 %v1114_v46 }
 0x2f8   : > { %v1337_v47 = vpop.eup %1336 }
 0x2f9   : > { %v941_v48 = vadd.f32 1.0, %v1337_v47 }
 0x2fa   : > { %v1339_v49 = vpop.eup %1338 }
 0x2fb   : > { %1340 = vrcp.f32 %v941_v48  ;;  %v942_v50 = vadd.f32 1.0, %v1339_v49 }
 0x2fd   : > { %1342 = vrcp.f32 %v942_v50 }
 0x305   : > { %v1341_v52 = vpop.eup %1340 }
 0x306   : > { %v947_v53 = vsel %vm934_vm2, %v1341_v52, %v926_v42 }
 0x307   : > { %v1343_v54 = vpop.eup %1342  ;;  %949 = vst [vmem:[%s302_s13] sm:$0xff] %v947_v53 }
 0x308   : > { %v948_v55 = vsel %vm934_vm2, %v1343_v54, %v929_v45 }
 0x309   : > { %950 = vst [vmem:[%s302_s13 + $0x8] sm:$0xff] %v948_v55 }
 0x30a   : > { %1413 = shalt.err (!%p1410_p11)
}
 0x30b   : > { %s1414_s15 = scalar_lea.hbm %s1688_s22, 256  ;;  %s1418_s17 = scalar_lea.hbm %s1740_s7, 768 }
 0x30c   : > { %p1415_p13 = scmp.ne.s32.totalorder %s1688_s22, %s1414_s15  ;;  %p1419_p6 = scmp.lt.u32.totalorder %s1688_s22, %s1740_s7 }
 0x30d   : > { %p1420_p9 = scmp.lt.u32.totalorder %s1418_s17, %s1414_s15  ;;  %p1422_p10 = scmp.lt.u32.totalorder %s1414_s15, %s1688_s22 }
 0x30e   : > { %p1416_p0 = pnand %p1415_p13, %p1754_p1 }
 0x30f   : > { %p1421_p12 = por %p1420_p9, %p1419_p6 }
 0x310   : > { %p1417_p5 = pneg %p1416_p0 }
 0x311   : > { %p1423_p2 = por %p1422_p10, %p1421_p12 }
 0x313   : > { %p1424_p3 = pnand %p1423_p2, %p1417_p5 }
 0x315   : > { %1427 = shalt.err (!%p1424_p3)
}
 0x316   : > { %s1482_s13 = smov 128   ;;  %s1483_s20 = smov 8  }
 0x317   : > { %1217 = dma.vmem_to_hbm [thread:$0]  (%p1754_p1), %s1690_s18, 256, %s1688_s22, %s1692_s23, %s1482_s13, %s1482_s13, %s1483_s20  }
 0x318 PF: > { %p1234_p4 = scmp.ge.s32.totalorder %s1470_s27, 2  ;;  %s980_s21 = sand.u32 1, %s1458_s24  }
 0x319   : > { %p1755_p7 = scmp.ne.s32.totalorder %s1746_s12, 0  ;;  %s981_s28 = scalar_lea.sflag [#allocation4], %s980_s21 }
 0x31b   : > { %p1227_p8 = pnand %p1234_p4, %p1755_p7 }
 0x31d   : > { %1453 = dma.done.wait (!%p1227_p8), %s981_s28, 256  }
 0x31e   : > { %1455 = vsyncadd (!%p1227_p8), %s981_s28, 4294967040  ;;  %s1756_s29 = sld [smem:[#allocation11_spill]]  ;;  %p19_p11 = scmp.ge.s32.totalorder %s1549_s30, 5  }
 0x31f   : > { %s1757_s24 = smov %s1462_s25  ;;  %s1758_s25 = smov %s1466_s26 }
 0x320   : > { %s1760_s27 = smov %s1549_s30  ;;  %21 = sbr.rel (!%p19_p11) target bundleno = 5 (0x5), region = 92 }
 0x324   : > { %s1759_s26 = smov %s1756_s29 }
 0x327   :  { %986 = vsyncpa [#allocation3], 1 }
 0x328   :  { %988 = vsyncpa [#allocation3 + $0x1], 1 }
 0x329   :  { %989 = vsyncpa [#allocation6], 1 }
 0x32a   :  { %990 = vsyncpa [#allocation4], 1 }
 0x32b   :  { %992 = vsyncpa [#allocation4 + $0x1], 1 }

</bundles_post_ra>
